<compile_context>
chip_gen: v5e
topology: v5e:2x2
jax: 0.10.0
libtpu: 0.0.40
codegen_flags: <defaults>
</compile_context>

<pallas_src>
import functools

import jax
import jax.numpy as jnp
from jax.experimental import pallas as pl
from jax.experimental.pallas import tpu as pltpu

# Physical unit constants (identical to the PyTorch module).
_EV_A_TO_N = 1.602176565e-09
_U_TO_KG = 1.66053904e-27
_M_TO_A = 1.0e10
_S_TO_FS = 1.0e15

# Fused conversion constant: accel = force * _K / masses
_K = _EV_A_TO_N * _M_TO_A / (_U_TO_KG * _S_TO_FS * _S_TO_FS)

# Lane-dense tiling parameters.
_LANE = 512            # block width (multiple of 128)
_MAX_BLOCK_ROWS = 512  # block height (multiple of 8) -> 1 MiB f32 per array/block


def _verlet_v_kernel(f_ref, f_old_ref, v_ref, coef_ref, out_ref):
    # v_new = vel_old + 0.5 * (a_old + a) * potim
    #       = vel_old + (force + force_old) * (0.5 * K * potim / masses)
    out_ref[...] = v_ref[...] + (f_ref[...] + f_old_ref[...]) * coef_ref[...]


@jax.jit
def verlet_v(force, force_old, vel_old, potim, masses):
    """Pallas equivalent of VerletV.forward."""
    n, d = force.shape
    dtype = force.dtype

    # Per-atom coefficient, broadcast over the xyz axis in the wrapper so the
    # kernel only ever touches lane-dense full-width slabs.
    coef = (0.5 * _K) * potim.astype(dtype) / masses.astype(dtype)   # [N]
    coef3 = jnp.broadcast_to(coef[:, None], (n, d))                  # [N, 3]

    # Flatten to a lane-dense (rows, _LANE) view; pad so blocks divide evenly.
    flat_len = n * d
    rows_needed = -(-flat_len // _LANE)                       # ceil
    block_rows = min(_MAX_BLOCK_ROWS, ((rows_needed + 7) // 8) * 8)
    padded_rows = -(-rows_needed // block_rows) * block_rows
    padded_len = padded_rows * _LANE

    def prep(x):
        x_flat = x.astype(dtype).reshape(-1)
        pad = padded_len - flat_len
        if pad:
            x_flat = jnp.pad(x_flat, (0, pad))
        return x_flat.reshape(padded_rows, _LANE)

    f2 = prep(force)
    fo2 = prep(force_old)
    v2 = prep(vel_old)
    c2 = prep(coef3)

    grid = (padded_rows // block_rows,)
    spec = pl.BlockSpec((block_rows, _LANE), lambda i: (i, 0))

    out2 = pl.pallas_call(
        _verlet_v_kernel,
        out_shape=jax.ShapeDtypeStruct((padded_rows, _LANE), dtype),
        grid_spec=pltpu.PrefetchScalarGridSpec(
            num_scalar_prefetch=0,
            grid=grid,
            in_specs=[spec, spec, spec, spec],
            out_specs=spec,
        ),
        compiler_params=pltpu.CompilerParams(
            dimension_semantics=("parallel",)),
    )(f2, fo2, v2, c2)

    return out2.reshape(-1)[:flat_len].reshape(n, d)


def _reference(force, force_old, vel_old, potim, masses):
    """Pure-JAX mirror of the PyTorch module (same op ordering)."""
    def accel(masses_, force_):
        m = masses_ * _U_TO_KG
        f = force_ * _EV_A_TO_N
        acc = f / m[:, None]
        return acc * _M_TO_A / (_S_TO_FS ** 2)

    a_old = accel(masses, force_old)
    a = accel(masses, force)
    return vel_old + 0.5 * (a_old + a) * potim[:, None]


def _run_case(key, n):
    d = 3
    k1, k2, k3, k4, k5 = jax.random.split(key, 5)
    force = jax.random.normal(k1, (n, d), dtype=jnp.float32)
    force_old = jax.random.normal(k2, (n, d), dtype=jnp.float32)
    vel_old = jax.random.normal(k3, (n, d), dtype=jnp.float32) * 0.01
    potim = 1.0 + 0.1 * jax.random.uniform(k4, (n,), dtype=jnp.float32)
    masses = 1.0 + 10.0 * jax.random.uniform(k5, (n,), dtype=jnp.float32)

    out = verlet_v(force, force_old, vel_old, potim, masses)
    out = jax.block_until_ready(out)

    ref = _reference(force, force_old, vel_old, potim, masses)
    assert out.shape == (n, d)
    assert jnp.allclose(out, ref, rtol=1e-5, atol=1e-6), f"mismatch vs reference (N={n})"


if __name__ == "__main__":
    key = jax.random.PRNGKey(0)
    ka, kb = jax.random.split(key)

    _run_case(ka, 16)     # small case consistent with the module
    _run_case(kb, 1000)   # ragged case (exercises the padding path)

    print("KERNEL_OK")
</pallas_src>

<mosaic_0001>
module attributes {stable_mosaic.version = 11 : i64} {
  func.func @_verlet_v_kernel(%arg0: i32, %arg1: memref<8x512xf32, #tpu.memory_space<vmem>>, %arg2: memref<8x512xf32, #tpu.memory_space<vmem>>, %arg3: memref<8x512xf32, #tpu.memory_space<vmem>>, %arg4: memref<8x512xf32, #tpu.memory_space<vmem>>, %arg5: memref<8x512xf32, #tpu.memory_space<vmem>>) attributes {dimension_semantics = [#tpu.dimension_semantics<parallel>], iteration_bounds = array<i64: 1>, scalar_prefetch = 0 : i64, scratch_operands = 0 : i64, tpu.core_type = #tpu.core_type<tc>, window_params = [{transform_indices = @transform_0, window_bounds = array<i64: 8, 512>}, {transform_indices = @transform_1, window_bounds = array<i64: 8, 512>}, {transform_indices = @transform_2, window_bounds = array<i64: 8, 512>}, {transform_indices = @transform_3, window_bounds = array<i64: 8, 512>}, {transform_indices = @transform_4, window_bounds = array<i64: 8, 512>}]} {
    %c0 = arith.constant 0 : index
    %c0_0 = arith.constant 0 : index
    %0 = vector.load %arg3[%c0, %c0_0] : memref<8x512xf32, #tpu.memory_space<vmem>>, vector<8x512xf32>
    %c0_1 = arith.constant 0 : index
    %c0_2 = arith.constant 0 : index
    %1 = vector.load %arg1[%c0_1, %c0_2] : memref<8x512xf32, #tpu.memory_space<vmem>>, vector<8x512xf32>
    %c0_3 = arith.constant 0 : index
    %c0_4 = arith.constant 0 : index
    %2 = vector.load %arg2[%c0_3, %c0_4] : memref<8x512xf32, #tpu.memory_space<vmem>>, vector<8x512xf32>
    %3 = arith.addf %1, %2 : vector<8x512xf32>
    %c0_5 = arith.constant 0 : index
    %c0_6 = arith.constant 0 : index
    %4 = vector.load %arg4[%c0_5, %c0_6] : memref<8x512xf32, #tpu.memory_space<vmem>>, vector<8x512xf32>
    %5 = arith.mulf %3, %4 : vector<8x512xf32>
    %6 = arith.addf %0, %5 : vector<8x512xf32>
    %c0_7 = arith.constant 0 : index
    %c0_8 = arith.constant 0 : index
    %7 = vector.load %arg5[%c0_7, %c0_8] : memref<8x512xf32, #tpu.memory_space<vmem>>, vector<8x512xf32>
    tpu.vector_store %arg5[%c0_7, %c0_8], %6 {strides = array<i32>} : memref<8x512xf32, #tpu.memory_space<vmem>>, vector<8x512xf32>,
    return
  }
  func.func @transform_0(%arg0: i32) -> (i32, i32) {
    %c0_i32 = arith.constant 0 : i32
    %c0_i32_0 = arith.constant 0 : i32
    return %arg0, %c0_i32 : i32, i32
  }
  func.func @transform_1(%arg0: i32) -> (i32, i32) {
    %c0_i32 = arith.constant 0 : i32
    %c0_i32_0 = arith.constant 0 : i32
    return %arg0, %c0_i32 : i32, i32
  }
  func.func @transform_2(%arg0: i32) -> (i32, i32) {
    %c0_i32 = arith.constant 0 : i32
    %c0_i32_0 = arith.constant 0 : i32
    return %arg0, %c0_i32 : i32, i32
  }
  func.func @transform_3(%arg0: i32) -> (i32, i32) {
    %c0_i32 = arith.constant 0 : i32
    %c0_i32_0 = arith.constant 0 : i32
    return %arg0, %c0_i32 : i32, i32
  }
  func.func @transform_4(%arg0: i32) -> (i32, i32) {
    %c0_i32 = arith.constant 0 : i32
    %c0_i32_0 = arith.constant 0 : i32
    return %arg0, %c0_i32 : i32, i32
  }
}

</mosaic_0001>

<bundles_post_ra>
// kernel: verlet_v.1
= control target key start
LH: loop header
LB: loop body
LE: loop exit
PB: predicated region body
PF: predicated region fallthrough
CT: control target
= control target key end

     0   :  { %s138_s0 = inlined_call_operand.vmem [shape: f32[8,512], index: 0, kind: input, shape index: {}]   ;;  %s139_s1 = inlined_call_operand.vmem [shape: f32[8,512], index: 1, kind: input, shape index: {}]   ;;  %s140_s2 = inlined_call_operand.vmem [shape: f32[8,512], index: 2, kind: input, shape index: {}]   ;;  %s141_s3 = inlined_call_operand.vmem [shape: f32[8,512], index: 3, kind: input, shape index: {}]   ;;  %s142_s4 = inlined_call_operand.vmem [shape: f32[8,512], index: 4, kind: output, shape index: {}]  }
   0x1   :  { %v21_v0 = vld [vmem:[%s138_s0] sm:$0xff]  ;;  %v22_v4 = vld [vmem:[%s138_s0 + $0x8] sm:$0xff]  ;;  %v23_v10 = vld [vmem:[%s138_s0 + $0x10] sm:$0xff] }
   0x2   :  { %v25_v1 = vld [vmem:[%s139_s1] sm:$0xff]  ;;  %v26_v6 = vld [vmem:[%s139_s1 + $0x8] sm:$0xff]  ;;  %v27_v11 = vld [vmem:[%s139_s1 + $0x10] sm:$0xff] }
   0x3   :  { %v29_v2 = vadd.f32 %v25_v1, %v21_v0  ;;  %v33_v3 = vld [vmem:[%s141_s3] sm:$0xff]  ;;  %v34_v7 = vld [vmem:[%s141_s3 + $0x8] sm:$0xff]  ;;  %v30_v9 = vadd.f32 %v26_v6, %v22_v4  ;;  %v35_v12 = vld [vmem:[%s141_s3 + $0x10] sm:$0xff]  ;;  %v31_v14 = vadd.f32 %v27_v11, %v23_v10 }
   0x4   :  { %v17_v5 = vld [vmem:[%s140_s2] sm:$0xff]  ;;  %v18_v13 = vld [vmem:[%s140_s2 + $0x8] sm:$0xff]  ;;  %v24_v15 = vld [vmem:[%s138_s0 + $0x18] sm:$0xff] }
   0x5   :  { %v37_v8 = vmul.f32 %v33_v3, %v29_v2  ;;  %v28_v16 = vld [vmem:[%s139_s1 + $0x18] sm:$0xff]  ;;  %v38_v18 = vmul.f32 %v34_v7, %v30_v9  ;;  %v19_v19 = vld [vmem:[%s140_s2 + $0x10] sm:$0xff]  ;;  %v39_v22 = vmul.f32 %v35_v12, %v31_v14 }
   0x6   :  { %v32_v20 = vadd.f32 %v28_v16, %v24_v15  ;;  %v36_v21 = vld [vmem:[%s141_s3 + $0x18] sm:$0xff] }
   0x7   :  { %v41_v17 = vadd.f32 %v37_v8, %v17_v5  ;;  %v20_v23 = vld [vmem:[%s140_s2 + $0x18] sm:$0xff]  ;;  %v42_v24 = vadd.f32 %v38_v18, %v18_v13  ;;  %v43_v26 = vadd.f32 %v39_v22, %v19_v19 }
   0x8   :  { %v40_v25 = vmul.f32 %v36_v21, %v32_v20 }
   0x9   :  { %45 = vst [vmem:[%s142_s4] sm:$0xff] %v41_v17 }
   0xa   :  { %46 = vst [vmem:[%s142_s4 + $0x8] sm:$0xff] %v42_v24  ;;  %v44_v27 = vadd.f32 %v40_v25, %v20_v23 }
   0xb   :  { %47 = vst [vmem:[%s142_s4 + $0x10] sm:$0xff] %v43_v26 }
   0xc   :  { %48 = vst [vmem:[%s142_s4 + $0x18] sm:$0xff] %v44_v27 }

</bundles_post_ra>
